<compile_context>
chip_gen: v5e
topology: v5e:2x2
jax: 0.10.0
libtpu: 0.0.40
codegen_flags: <defaults>
</compile_context>

<pallas_src>
import functools

import numpy as np
import jax
import jax.numpy as jnp
from jax import lax
from jax.experimental import pallas as pl
from jax.experimental.pallas import tpu as pltpu


def _lcnn9_group_kernel(x_ref, w1_ref, w2_ref, b2_ref, m_ref, o_ref,
                        *, K, W, pad, Cin, Cpad, Cout, Lb):
    # ---- stage 1: 1x1 conv (bias folded via the ones-row of x) + MFM max ----
    y1 = jnp.dot(w1_ref[...], x_ref[...], preferred_element_type=jnp.float32)
    a1 = jnp.maximum(y1[:Cin], y1[Cin:])                     # (Cin, Lb)
    if Cpad > Cin:
        # Pad channels to an 8-aligned sublane block so the tap stacking below
        # is pure buffer placement (no sublane relayout).
        a1 = jnp.concatenate(
            [a1, jnp.zeros((Cpad - Cin, Lb), jnp.float32)], axis=0)

    # ---- stage 2: KxK conv as ONE MXU dot over sublane-stacked taps ---------
    # Each tap = lane roll (XLU) of the flat spatial layout, multiplied by the
    # precomputed zero-padding border mask (which also zeroes any cross-image
    # wrap positions inside the B-image block).
    masks = m_ref[...]                                       # (K*K, Lb)
    patches = []
    for t in range(K * K):
        off = (t // K - pad) * W + (t % K - pad)
        if off == 0:
            patches.append(a1)                               # center tap: all valid
        else:
            shifted = pltpu.roll(a1, shift=(-off) % Lb, axis=1)
            patches.append(shifted * masks[t:t + 1])
    stacked = jnp.concatenate(patches, axis=0)               # (K*K*Cpad, Lb)

    y2 = jnp.dot(w2_ref[...], stacked, preferred_element_type=jnp.float32)
    y2 = y2 + b2_ref[...]                                    # (2*Cout, Lb)
    o_ref[...] = jnp.maximum(y2[:Cout], y2[Cout:]).astype(o_ref.dtype)


def _pick_block_batch(N, per_image_bytes, vmem_budget_bytes):
    """Largest divisor of N that fits the VMEM budget; prefer >=2 grid blocks
    (v7x has 2 TensorCores) when N > 1."""
    if N <= 1:
        return max(N, 1)
    cap = max(1, int(vmem_budget_bytes // max(per_image_bytes, 1)))
    b = max(1, min(cap, -(-N // 2)))
    while N % b:
        b -= 1
    return b


def lcnn9_group_forward(x_nchw, params, *, vmem_budget_bytes=8 << 20):
    """x_nchw: (N, Cin, H, W).  params: PyTorch-layout conv weights/biases."""
    N, Cin, H, W = x_nchw.shape
    HW = H * W
    w1 = params["w1"]                                        # (2*Cin, Cin, 1, 1)
    b1 = params["b1"]                                        # (2*Cin,)
    w2 = params["w2"]                                        # (2*Cout, Cin, K, K)
    b2 = params["b2"]                                        # (2*Cout,)
    K = w2.shape[2]
    Cout = w2.shape[0] // 2
    pad = params["padding"]
    # TODO(synk): stride > 1 not implemented (LCNN9_group instantiations use stride=1).
    assert params["stride"] == 1

    Cpad = ((Cin + 7) // 8) * 8                              # 8-aligned tap blocks

    # ---- tiny host-side reshapes (all lane-dense, no per-step work) ---------
    # x: NCHW -> channel-major (Cin, N*HW) + a ones row that folds b1.
    xf = jnp.transpose(x_nchw.reshape(N, Cin, HW), (1, 0, 2)).reshape(Cin, N * HW)
    x_aug = jnp.concatenate([xf, jnp.ones((1, N * HW), xf.dtype)], axis=0)

    w1_aug = jnp.concatenate([w1.reshape(2 * Cin, Cin),
                              b1.reshape(2 * Cin, 1)], axis=1)   # (2Cin, Cin+1)

    # w2 flattened to a single lane-dense (2*Cout, K*K*Cpad) matrix with zero
    # columns on the padded channels; matches the kernel's tap stacking order.
    w2_t = jnp.transpose(w2, (2, 3, 0, 1))                   # (K, K, 2*Cout, Cin)
    w2_t = jnp.pad(w2_t, ((0, 0), (0, 0), (0, 0), (0, Cpad - Cin)))
    w2_flat = jnp.transpose(w2_t, (2, 0, 1, 3)).reshape(2 * Cout, K * K * Cpad)
    b2_col = b2.reshape(2 * Cout, 1)

    # ---- batch-block size (VMEM-aware; >=2 blocks when possible) ------------
    rows = ((Cin + 1 + Cout) * 2            # double-buffered x / out blocks
            + Cpad * (K * K + 1)            # stacked taps + padded a1
            + 2 * Cout + K * K)             # y2 + masks
    per_image_bytes = rows * HW * 4
    block_b = _pick_block_batch(N, per_image_bytes, vmem_budget_bytes)
    if (block_b * HW) % 128 != 0:
        block_b = N        # full lane extent is exempt from the 128 constraint
    num_blocks = N // block_b
    Lb = block_b * HW

    # ---- precomputed zero-padding border masks, replicated per image --------
    pos = jnp.arange(HW, dtype=jnp.int32)
    hh, ww = pos // W, pos % W
    mask_rows = []
    for t in range(K * K):
        dh, dw = t // K - pad, t % K - pad
        mask_rows.append((hh + dh >= 0) & (hh + dh < H) &
                         (ww + dw >= 0) & (ww + dw < W))
    mask = jnp.stack(mask_rows).astype(jnp.float32)          # (K*K, HW)
    mask = jnp.tile(mask, (1, block_b))                      # (K*K, Lb)

    kernel = functools.partial(_lcnn9_group_kernel, K=K, W=W, pad=pad,
                               Cin=Cin, Cpad=Cpad, Cout=Cout, Lb=Lb)
    out = pl.pallas_call(
        kernel,
        out_shape=jax.ShapeDtypeStruct((Cout, N * HW), x_nchw.dtype),
        grid_spec=pltpu.PrefetchScalarGridSpec(
            num_scalar_prefetch=0,
            grid=(num_blocks,),
            in_specs=[
                pl.BlockSpec((Cin + 1, Lb), lambda g: (0, g)),
                pl.BlockSpec((2 * Cin, Cin + 1), lambda g: (0, 0)),
                pl.BlockSpec((2 * Cout, K * K * Cpad), lambda g: (0, 0)),
                pl.BlockSpec((2 * Cout, 1), lambda g: (0, 0)),
                pl.BlockSpec((K * K, Lb), lambda g: (0, 0)),
            ],
            out_specs=pl.BlockSpec((Cout, Lb), lambda g: (0, g)),
        ),
        compiler_params=pltpu.CompilerParams(
            dimension_semantics=("parallel",),
            vmem_limit_bytes=32 * 1024 * 1024),
    )(x_aug, w1_aug, w2_flat, b2_col, mask)

    return jnp.transpose(out.reshape(Cout, N, HW), (1, 0, 2)).reshape(N, Cout, H, W)


# ---------------------------------------------------------------------------
# Pure-JAX reference (NCHW, OIHW) for verification.
# ---------------------------------------------------------------------------
def lcnn9_group_reference(x, params):
    Cin = x.shape[1]
    y = lax.conv_general_dilated(
        x, params["w1"], window_strides=(1, 1), padding=[(0, 0), (0, 0)],
        dimension_numbers=("NCHW", "OIHW", "NCHW"))
    y = y + params["b1"].reshape(1, -1, 1, 1)
    a = jnp.maximum(y[:, :Cin], y[:, Cin:])

    p = params["padding"]
    s = params["stride"]
    Cout = params["w2"].shape[0] // 2
    y = lax.conv_general_dilated(
        a, params["w2"], window_strides=(s, s), padding=[(p, p), (p, p)],
        dimension_numbers=("NCHW", "OIHW", "NCHW"))
    y = y + params["b2"].reshape(1, -1, 1, 1)
    return jnp.maximum(y[:, :Cout], y[:, Cout:])


if __name__ == "__main__":
    key = jax.random.PRNGKey(0)
    N, Cin, H, W = 2, 4, 16, 16
    Cout, K, stride, padding = 8, 3, 1, 1
    ks = jax.random.split(key, 5)

    x = jax.random.normal(ks[0], (N, Cin, H, W), jnp.float32)
    params = dict(
        # mfm conv_a: Conv2d(Cin, 2*Cin, kernel_size=1, stride=1, padding=0)
        w1=jax.random.normal(ks[1], (2 * Cin, Cin, 1, 1), jnp.float32) * 0.2,
        b1=jax.random.normal(ks[2], (2 * Cin,), jnp.float32) * 0.1,
        # mfm conv: Conv2d(Cin, 2*Cout, kernel_size=K, stride, padding)
        w2=jax.random.normal(ks[3], (2 * Cout, Cin, K, K), jnp.float32) * 0.1,
        b2=jax.random.normal(ks[4], (2 * Cout,), jnp.float32) * 0.1,
        stride=stride, padding=padding,
    )

    out = jax.block_until_ready(lcnn9_group_forward(x, params))
    ref = lcnn9_group_reference(x, params)

    assert out.shape == (N, Cout, H, W), out.shape
    np.testing.assert_allclose(np.asarray(out), np.asarray(ref), rtol=1e-4, atol=1e-4)
    print("KERNEL_OK")
</pallas_src>

<mosaic_0001>
module attributes {stable_mosaic.version = 11 : i64} {
  func.func @_lcnn9_group_kernel(%arg0: i32, %arg1: memref<5x256xf32, #tpu.memory_space<vmem>>, %arg2: memref<8x5xf32, #tpu.memory_space<vmem>>, %arg3: memref<16x72xf32, #tpu.memory_space<vmem>>, %arg4: memref<16x1xf32, #tpu.memory_space<vmem>>, %arg5: memref<9x256xf32, #tpu.memory_space<vmem>>, %arg6: memref<8x256xf32, #tpu.memory_space<vmem>>) attributes {dimension_semantics = [#tpu.dimension_semantics<parallel>], iteration_bounds = array<i64: 2>, scalar_prefetch = 0 : i64, scratch_operands = 0 : i64, tpu.core_type = #tpu.core_type<tc>, window_params = [{transform_indices = @transform_0, window_bounds = array<i64: 5, 256>}, {pipeline_mode = #tpu.pipeline_mode<synchronous>, transform_indices = @transform_1, window_bounds = array<i64: 8, 5>}, {pipeline_mode = #tpu.pipeline_mode<synchronous>, transform_indices = @transform_2, window_bounds = array<i64: 16, 72>}, {pipeline_mode = #tpu.pipeline_mode<synchronous>, transform_indices = @transform_3, window_bounds = array<i64: 16, 1>}, {pipeline_mode = #tpu.pipeline_mode<synchronous>, transform_indices = @transform_4, window_bounds = array<i64: 9, 256>}, {transform_indices = @transform_5, window_bounds = array<i64: 8, 256>}]} {
    %c0 = arith.constant 0 : index
    %c0_0 = arith.constant 0 : index
    %0 = vector.load %arg2[%c0, %c0_0] : memref<8x5xf32, #tpu.memory_space<vmem>>, vector<8x5xf32>
    %c0_1 = arith.constant 0 : index
    %c0_2 = arith.constant 0 : index
    %1 = vector.load %arg1[%c0_1, %c0_2] : memref<5x256xf32, #tpu.memory_space<vmem>>, vector<5x256xf32>
    %cst = arith.constant dense<0.000000e+00> : vector<8x256xf32>
    %2 = tpu.matmul %0, %1, %cst {dimension_numbers = #tpu.dot_dimension_numbers<[1], [0], [0], [1], [0, 0, 1, 1], [], []>} : vector<8x5xf32>, vector<5x256xf32>, vector<8x256xf32> -> vector<8x256xf32>
    %3 = vector.extract_strided_slice %2 {offsets = [0, 0], sizes = [4, 256], strides = [1, 1]} : vector<8x256xf32> to vector<4x256xf32>
    %4 = vector.extract_strided_slice %2 {offsets = [4, 0], sizes = [4, 256], strides = [1, 1]} : vector<8x256xf32> to vector<4x256xf32>
    %5 = arith.maximumf %3, %4 : vector<4x256xf32>
    %cst_3 = arith.constant 0.000000e+00 : f32
    %6 = vector.broadcast %cst_3 : f32 to vector<4x256xf32>
    %7 = tpu.concatenate %5, %6 in 0 : vector<4x256xf32>, vector<4x256xf32> -> vector<8x256xf32>
    %c0_4 = arith.constant 0 : index
    %c0_5 = arith.constant 0 : index
    %8 = vector.load %arg5[%c0_4, %c0_5] : memref<9x256xf32, #tpu.memory_space<vmem>>, vector<9x256xf32>
    %c17_i32 = arith.constant 17 : i32
    %9 = tpu.dynamic_rotate %7 by %c17_i32 dim 1 : vector<8x256xf32>, i32 -> vector<8x256xf32>
    %10 = vector.extract_strided_slice %8 {offsets = [0, 0], sizes = [1, 256], strides = [1, 1]} : vector<9x256xf32> to vector<1x256xf32>
    %11 = vector.broadcast %10 : vector<1x256xf32> to vector<8x256xf32>
    %12 = arith.mulf %9, %11 : vector<8x256xf32>
    %c16_i32 = arith.constant 16 : i32
    %13 = tpu.dynamic_rotate %7 by %c16_i32 dim 1 : vector<8x256xf32>, i32 -> vector<8x256xf32>
    %14 = vector.extract_strided_slice %8 {offsets = [1, 0], sizes = [1, 256], strides = [1, 1]} : vector<9x256xf32> to vector<1x256xf32>
    %15 = vector.broadcast %14 : vector<1x256xf32> to vector<8x256xf32>
    %16 = arith.mulf %13, %15 : vector<8x256xf32>
    %c15_i32 = arith.constant 15 : i32
    %17 = tpu.dynamic_rotate %7 by %c15_i32 dim 1 : vector<8x256xf32>, i32 -> vector<8x256xf32>
    %18 = vector.extract_strided_slice %8 {offsets = [2, 0], sizes = [1, 256], strides = [1, 1]} : vector<9x256xf32> to vector<1x256xf32>
    %19 = vector.broadcast %18 : vector<1x256xf32> to vector<8x256xf32>
    %20 = arith.mulf %17, %19 : vector<8x256xf32>
    %c1_i32 = arith.constant 1 : i32
    %21 = tpu.dynamic_rotate %7 by %c1_i32 dim 1 : vector<8x256xf32>, i32 -> vector<8x256xf32>
    %22 = vector.extract_strided_slice %8 {offsets = [3, 0], sizes = [1, 256], strides = [1, 1]} : vector<9x256xf32> to vector<1x256xf32>
    %23 = vector.broadcast %22 : vector<1x256xf32> to vector<8x256xf32>
    %24 = arith.mulf %21, %23 : vector<8x256xf32>
    %c255_i32 = arith.constant 255 : i32
    %25 = tpu.dynamic_rotate %7 by %c255_i32 dim 1 : vector<8x256xf32>, i32 -> vector<8x256xf32>
    %26 = vector.extract_strided_slice %8 {offsets = [5, 0], sizes = [1, 256], strides = [1, 1]} : vector<9x256xf32> to vector<1x256xf32>
    %27 = vector.broadcast %26 : vector<1x256xf32> to vector<8x256xf32>
    %28 = arith.mulf %25, %27 : vector<8x256xf32>
    %c241_i32 = arith.constant 241 : i32
    %29 = tpu.dynamic_rotate %7 by %c241_i32 dim 1 : vector<8x256xf32>, i32 -> vector<8x256xf32>
    %30 = vector.extract_strided_slice %8 {offsets = [6, 0], sizes = [1, 256], strides = [1, 1]} : vector<9x256xf32> to vector<1x256xf32>
    %31 = vector.broadcast %30 : vector<1x256xf32> to vector<8x256xf32>
    %32 = arith.mulf %29, %31 : vector<8x256xf32>
    %c240_i32 = arith.constant 240 : i32
    %33 = tpu.dynamic_rotate %7 by %c240_i32 dim 1 : vector<8x256xf32>, i32 -> vector<8x256xf32>
    %34 = vector.extract_strided_slice %8 {offsets = [7, 0], sizes = [1, 256], strides = [1, 1]} : vector<9x256xf32> to vector<1x256xf32>
    %35 = vector.broadcast %34 : vector<1x256xf32> to vector<8x256xf32>
    %36 = arith.mulf %33, %35 : vector<8x256xf32>
    %c239_i32 = arith.constant 239 : i32
    %37 = tpu.dynamic_rotate %7 by %c239_i32 dim 1 : vector<8x256xf32>, i32 -> vector<8x256xf32>
    %38 = vector.extract_strided_slice %8 {offsets = [8, 0], sizes = [1, 256], strides = [1, 1]} : vector<9x256xf32> to vector<1x256xf32>
    %39 = vector.broadcast %38 : vector<1x256xf32> to vector<8x256xf32>
    %40 = arith.mulf %37, %39 : vector<8x256xf32>
    %41 = tpu.concatenate %12, %16, %20, %24, %7, %28, %32, %36, %40 in 0 : vector<8x256xf32>, vector<8x256xf32>, vector<8x256xf32>, vector<8x256xf32>, vector<8x256xf32>, vector<8x256xf32>, vector<8x256xf32>, vector<8x256xf32>, vector<8x256xf32> -> vector<72x256xf32>
    %c0_6 = arith.constant 0 : index
    %c0_7 = arith.constant 0 : index
    %42 = vector.load %arg3[%c0_6, %c0_7] : memref<16x72xf32, #tpu.memory_space<vmem>>, vector<16x72xf32>
    %cst_8 = arith.constant dense<0.000000e+00> : vector<16x256xf32>
    %43 = tpu.matmul %42, %41, %cst_8 {dimension_numbers = #tpu.dot_dimension_numbers<[1], [0], [0], [1], [0, 0, 1, 1], [], []>} : vector<16x72xf32>, vector<72x256xf32>, vector<16x256xf32> -> vector<16x256xf32>
    %c0_9 = arith.constant 0 : index
    %c0_10 = arith.constant 0 : index
    %44 = vector.load %arg4[%c0_9, %c0_10] : memref<16x1xf32, #tpu.memory_space<vmem>>, vector<16x1xf32>
    %45 = vector.broadcast %44 : vector<16x1xf32> to vector<16x256xf32>
    %46 = arith.addf %43, %45 : vector<16x256xf32>
    %47 = vector.extract_strided_slice %46 {offsets = [0, 0], sizes = [8, 256], strides = [1, 1]} : vector<16x256xf32> to vector<8x256xf32>
    %48 = vector.extract_strided_slice %46 {offsets = [8, 0], sizes = [8, 256], strides = [1, 1]} : vector<16x256xf32> to vector<8x256xf32>
    %49 = arith.maximumf %47, %48 : vector<8x256xf32>
    %c0_11 = arith.constant 0 : index
    %c0_12 = arith.constant 0 : index
    %50 = vector.load %arg6[%c0_11, %c0_12] : memref<8x256xf32, #tpu.memory_space<vmem>>, vector<8x256xf32>
    tpu.vector_store %arg6[%c0_11, %c0_12], %49 {strides = array<i32>} : memref<8x256xf32, #tpu.memory_space<vmem>>, vector<8x256xf32>,
    return
  }
  func.func @transform_0(%arg0: i32) -> (i32, i32) {
    %c0_i32 = arith.constant 0 : i32
    %c0_i32_0 = arith.constant 0 : i32
    return %c0_i32, %arg0 : i32, i32
  }
  func.func @transform_1(%arg0: i32) -> (i32, i32) {
    %c0_i32 = arith.constant 0 : i32
    %c0_i32_0 = arith.constant 0 : i32
    %c0_i32_1 = arith.constant 0 : i32
    return %c0_i32, %c0_i32_0 : i32, i32
  }
  func.func @transform_2(%arg0: i32) -> (i32, i32) {
    %c0_i32 = arith.constant 0 : i32
    %c0_i32_0 = arith.constant 0 : i32
    %c0_i32_1 = arith.constant 0 : i32
    return %c0_i32, %c0_i32_0 : i32, i32
  }
  func.func @transform_3(%arg0: i32) -> (i32, i32) {
    %c0_i32 = arith.constant 0 : i32
    %c0_i32_0 = arith.constant 0 : i32
    %c0_i32_1 = arith.constant 0 : i32
    return %c0_i32, %c0_i32_0 : i32, i32
  }
  func.func @transform_4(%arg0: i32) -> (i32, i32) {
    %c0_i32 = arith.constant 0 : i32
    %c0_i32_0 = arith.constant 0 : i32
    %c0_i32_1 = arith.constant 0 : i32
    return %c0_i32, %c0_i32_0 : i32, i32
  }
  func.func @transform_5(%arg0: i32) -> (i32, i32) {
    %c0_i32 = arith.constant 0 : i32
    %c0_i32_0 = arith.constant 0 : i32
    return %c0_i32, %arg0 : i32, i32
  }
}

</mosaic_0001>

<bundles_post_ra>
// kernel: tpu_custom_call.1
= control target key start
LH: loop header
LB: loop body
LE: loop exit
PB: predicated region body
PF: predicated region fallthrough
CT: control target
= control target key end

     0   :  { %10 = vsyncpa [#allocation3], 0  ;;  %s1149_s0 = inlined_call_operand.hbm [shape: f32[5,512], index: 0, kind: input, shape index: {}]   ;;  %s1150_s1 = inlined_call_operand.hbm [shape: f32[8,5], index: 1, kind: input, shape index: {}]   ;;  %s1151_s2 = inlined_call_operand.vmem [shape: f32[16,72], index: 2, kind: input, shape index: {}]   ;;  %s1152_s3 = inlined_call_operand.vmem [shape: f32[16,1], index: 3, kind: input, shape index: {}]   ;;  %s1153_s4 = inlined_call_operand.hbm [shape: f32[9,256], index: 4, kind: input, shape index: {}]   ;;  %s1154_s5 = inlined_call_operand.hbm [shape: f32[8,512], index: 5, kind: output, shape index: {}]  }
   0x1   :  { %12 = vsyncpa [#allocation3 + $0x1], 0 }
   0x2   :  { %13 = vsyncpa [#allocation6], 0 }
   0x3   :  { %14 = vsyncpa [#allocation4], 0 }
   0x4   :  { %16 = vsyncpa [#allocation4 + $0x1], 0  ;;  %s948_s18 = smov 0   ;;  %s950_s19 = smov 0  }
   0x5   :  { %s952_s20 = smov 0   ;;  %s954_s21 = smov 0  }
   0x6 LB: > { %s969_s22 = sadd.s32 4294967295, %s903_s21   ;;  %s612_s23 = sadd.s32 4294967294, %s903_s21   ;;  %s903_s21 = sphi %s954_s21, %s1164_s21   ;;  %s899_s20 = sphi %s952_s20, %s1163_s20   ;;  %s895_s19 = sphi %s950_s19, %s1162_s19   ;;  %s891_s18 = sphi %s948_s18, %s1161_s18  }
   0x7   : > { %p42_p0 = scmp.ne.s32.totalorder %s895_s19, %s891_s18  ;;  %p43_p1 = scmp.eq.s32.totalorder %s969_s22, 0 }
   0x8   : > { %p150_p2 = scmp.eq.s32.totalorder %s969_s22, 1  ;;  %p156_p3 = scmp.eq.s32.totalorder %s612_s23, 1 }
   0x9   : > { %p978_p4 = por %p43_p1, %p42_p0  ;;  %p613_p5 = scmp.ge.s32.totalorder %s903_s21, 1 }
   0xa   : > { %p983_p6 = por %p156_p3, %p42_p0  ;;  %p163_p7 = scmp.lt.s32.totalorder %s903_s21, 3 }
   0xb   : > { %s175_s28 = sshll.u32 %s1150_s1, 4  ;;  %s905_s30 = smov [#allocation5]   ;;  %s176_s28 = int_to_ptr.hbm [resolvable:$true] %s175_s28 }
   0xc   : > { %p991_p8 = pnand %p613_p5, %p163_p7  ;;  %s177_s6 = sshll.u32 %s905_s30, 4  ;;  %s178_s6 = int_to_ptr.vmem [resolvable:$true] %s177_s6 }
   0xd   : > { %s192_s9 = sshll.u32 %s1153_s4, 4  ;;  %s906_s10 = smov [#allocation7]   ;;  %s193_s9 = int_to_ptr.hbm [resolvable:$true] %s192_s9 }
   0xe   : > { %p672_p10 = pneg %p991_p8  ;;  %s194_s11 = sshll.u32 %s906_s10, 4  ;;  %s195_s11 = int_to_ptr.vmem [resolvable:$true] %s194_s11 }
   0xf   : > { %s907_s12 = smov 256   ;;  %s908_s13 = smov 16  }
  0x10   : > { %p673_p11 = pnand %p672_p10, %p43_p1  ;;  %s1004_s14 = sadd.s32 1, %s903_s21  }
  0x11   : > { %s26_s15 = ssub.s32 %s903_s21, %s1004_s14  ;;  %s29_s16 = sadd.s32 1, %s899_s20 }
  0x12   : > { %675 = dma.hbm_to_vmem [thread:$0]  (!%p673_p11), %s176_s28, 128, %s178_s6, [#allocation6]  }
  0x13   : > { %678 = dma.hbm_to_vmem [thread:$0]  (!%p673_p11), %s193_s9, 512, %s195_s11, [#allocation6], %s907_s12, %s907_s12, %s908_s13  }
  0x14   : > { %p27_p12 = scmp.eq.s32.totalorder %s26_s15, 0  ;;  %p36_p13 = scmp.ne.s32.totalorder %s899_s20, %s895_s19 }
  0x15   : > { %p37_p0 = scmp.eq.s32.totalorder %s903_s21, 0  ;;  %p689_p7 = scmp.lt.s32.totalorder %s903_s21, 2 }
  0x16   : > { %s1013_s17 = scalar_select %p27_p12, %s899_s20, %s29_s16  }
  0x17   : > { %p38_p3 = por %p37_p0, %p36_p13  ;;  %p1017_p5 = por %p150_p2, %p36_p13 }
  0x18   : > { %s208_s26 = sand.u32 1, %s899_s20   ;;  %s640_s28 = sshll.u32 %s903_s21, 4 }
  0x19   : > { %s617_s27 = sshll.u32 %s208_s26, 4  ;;  %s217_s7 = scalar_lea.hbm %s1149_s0, %s640_s28 }
  0x1a   : > { %s212_s8 = scalar_lea.vmem [#allocation2], %s617_s27  ;;  %s219_s10 = sshll.u32 %s217_s7, 4  ;;  %s220_s10 = int_to_ptr.hbm [resolvable:$true] %s219_s10 }
  0x1b   : > { %s221_s9 = sshll.u32 %s212_s8, 4  ;;  %p1027_p10 = pnand %p689_p7, %p38_p3  ;;  %s222_s9 = int_to_ptr.vmem [resolvable:$true] %s221_s9 }
  0x1c   : > { %s209_s12 = scalar_lea.sflag [#allocation3], %s208_s26  ;;  %s803_s13 = sshra.s32 %s220_s10, 4  ;;  %s804_s13 = int_to_ptr.hbm [resolvable:$true] %s803_s13 }
  0x1d   : > { %s805_s15 = scalar_lea.hbm %s804_s13, 16  ;;  %p807_p11 = pneg %p1027_p10 }
  0x1e   : > { %p806_p2 = scmp.ne.s32.totalorder %s804_s13, %s805_s15  ;;  %s810_s28 = scalar_lea.hbm %s1149_s0, 32 }
  0x1f   : > { %p811_p0 = scmp.lt.s32.totalorder %s804_s13, %s1149_s0  ;;  %p812_p3 = scmp.lt.s32.totalorder %s810_s28, %s805_s15 }
  0x20   : > { %p808_p12 = pnand %p807_p11, %p806_p2 }
  0x21   : > { %p813_p7 = por %p812_p3, %p811_p0 }
  0x22   : > { %p809_p13 = pneg %p808_p12 }
  0x24   : > { %p814_p9 = pnand %p813_p7, %p809_p13 }
  0x26   : > { %817 = shalt.err (!%p814_p9)
}
  0x27   : > { %682 = dma.hbm_to_vmem [thread:$0]  (!%p1027_p10), %s220_s10, 256, %s222_s9, %s209_s12  }
  0x28   : > { %230 = sbr.rel (%p991_p8) target bundleno = 482 (0x1e2), region = 40  ;;  %s1044_s26 = sand.u32 (!%p991_p8), 1, %s895_s19  }
  0x29   : > { %s621_s7 = sshll.u32 (!%p991_p8), %s1044_s26, 4  ;;  %s233_s8 = scalar_lea.sflag (!%p991_p8), [#allocation3], %s1044_s26 }
  0x2a   : > { %s236_s13 = scalar_lea.vmem (!%p991_p8), [#allocation2], %s621_s7 }
  0x2d   : > { %878 = dma.done.wait (%p978_p4), %s233_s8, 256  }
  0x2e   : > { %880 = vsyncadd (%p978_p4), %s233_s8, 4294967040 }
  0x2f   : > { %882 = dma.done.wait (%p43_p1), [#allocation6], 640  }
  0x30   : > { %884 = vsyncadd (%p43_p1), [#allocation6], 4294966656  ;;  %vm283_vm0 = vcmask 1044480   ;;  %vm279_vm1 = vcmask 39936   ;;  %v277_v0 = vld [vmem:[%s236_s13] sm:$0x1f]  ;;  %v349_v13 = vlaneseq }
  0x31   : > { %v276_v1 = vld [vmem:[#allocation5] sm:$0xff]  ;;  %v278_v2 = vld [vmem:[%s236_s13 + $0x8] sm:$0x1f]  ;;  %625 = vmatpush.msk.msra.mxu0 %vm283_vm0, %v277_v0  ;;  %vm338_vm2 = vcmask 1043456   ;;  %s909_s24 = smov 113   ;;  %s910_s29 = smov 112  }
  0x32   : > { %627 = vmatpush.msk.msra.mxu1 %vm283_vm0, %v278_v2  ;;  %626 = vmatmul.msk.f32.vlgmr.msra.gmra.mxu0 %vm279_vm1, %v276_v1  ;;  %s911_s9 = smov 111   ;;  %s912_s10 = smov 1   ;;  %v1066_v15 = vand.u32 127, %v349_v13  ;;  %v741_v17 = vld [vmem:[#allocation7 + $0x10] ss:$0 sm:$0xff]  ;;  %v1070_v20 = vld [vmem:[#allocation7] sm:$0xff] }
  0x33   : > { %628 = vmatmul.msk.f32.vlgmr.msra.gmra.mxu1 %vm279_vm1, %v276_v1  ;;  %s913_s11 = smov 127   ;;  %s914_s12 = smov 15   ;;  %v742_v18 = vld [vmem:[#allocation7 + $0x18] ss:$0 sm:$0xff]  ;;  %v420_v22 = vperm.slane %v1070_v20, 7  ;;  %v1074_v23 = vld [vmem:[#allocation7 + $0x8] sm:$0xff] }
  0x34   : > { %s915_s15 = smov 17   ;;  %s916_s16 = smov 16   ;;  %vm417_vm3 = vcmp.lt.s32.totalorder %v1066_v15, 112  ;;  %vm428_vm4 = vcmp.lt.s32.totalorder %v1066_v15, 111  ;;  %vm406_vm5 = vcmp.lt.s32.totalorder %v1066_v15, 113  ;;  %v421_v27 = vperm.slane %v1074_v23, 7 }
  0x35   : > { %v409_v31 = vperm.slane %v1070_v20, 6  ;;  %v410_v33 = vperm.slane %v1074_v23, 6  ;;  %vm395_vm6 = vcmp.lt.s32.totalorder %v1066_v15, 127  ;;  %v398_v39 = vperm.slane %v1070_v20, 5  ;;  %v437_v44 = vld [vmem:[%s1152_s3] sm:$0xff]  ;;  %v438_v45 = vld [vmem:[%s1152_s3 + $0x8] sm:$0xff] }
  0x36   : > { %v399_v40 = vperm.slane %v1074_v23, 5  ;;  %v917_v50 = vmov 0   ;;  %vm373_vm7 = vcmp.lt.s32.totalorder %v1066_v15, 15  ;;  %vm384_vm8 = vcmp.lt.s32.totalorder %v1066_v15, 1 }
  0x37   : > { %738 = vset.pattern.permute.xlu1 %v917_v50  ;;  %739 = vset.pattern.permute.xlu2 %v917_v50  ;;  %v387_v51 = vperm.slane %v1070_v20, 3  ;;  %v388_v52 = vperm.slane %v1074_v23, 3  ;;  %v376_v56 = vperm.slane %v1070_v20, 2  ;;  %v377_v60 = vperm.slane %v1074_v23, 2 }
  0x38   : > { %740 = vset.pattern.permute.xlu0 %v917_v50  ;;  %vm362_vm9 = vcmp.lt.s32.totalorder %v1066_v15, 16  ;;  %v365_v2 = vperm.slane %v1070_v20, 1  ;;  %vm351_vm10 = vcmp.lt.s32.totalorder %v1066_v15, 17  ;;  %vm449_vm11 = vcmask 588800   ;;  %v435_v15 = vld [vmem:[%s1151_s2] sm:$0xff] }
  0xaf   : > { %v307_v3 = vpop.f32.mrf.mxu0 }
  0xb0   : > { %v332_v4 = vrot.slane %v307_v3, 4  ;;  %v327_v5 = vpop.f32.mrf.mxu1 }
  0xb1   : > { %v333_v8 = vrot.slane %v327_v5, 4 }
  0xb2   : > { %v1058_v6 = vmax.f32 %v307_v3, %v332_v4  ;;  %v366_v3 = vperm.slane %v1074_v23, 1 }
  0xb3   : > { %v1062_v9 = vmax.f32 %v327_v5, %v333_v8 }
  0xb4   : > { %v339_v7 = vsel %vm338_vm2, %v1058_v6, 0.0 }
  0xb5   : > { %402 = vrot.lane.b32.xlu2 %v339_v7, %s909_s24  ;;  %413 = vrot.lane.b32.xlu1 %v339_v7, %s910_s29  ;;  %v340_v10 = vsel %vm338_vm2, %v1062_v9, 0.0 }
  0xb6   : > { %424 = vrot.lane.b32.xlu0 %v339_v7, %s911_s9 }
  0xbd   : > { %404 = vrot.lane.b32.xlu2 %v340_v10, %s909_s24  ;;  %415 = vrot.lane.b32.xlu1 %v340_v10, %s910_s29 }
  0xbe   : > { %426 = vrot.lane.b32.xlu0 %v340_v10, %s911_s9  ;;  %s641_s9 = sshll.u32 %s969_s22, 4  ;;  %s507_s22 = scalar_lea.sflag [#allocation4], %s1044_s26 }
  0xc5   : > { %380 = vrot.lane.b32.xlu2 %v339_v7, %s912_s10  ;;  %393 = vrot.lane.b32.xlu1 %v340_v10, %s913_s11 }
  0xc6   : > { %391 = vrot.lane.b32.xlu0 %v339_v7, %s913_s11 }
  0xcd   : > { %371 = vrot.lane.b32.xlu2 %v340_v10, %s914_s12  ;;  %369 = vrot.lane.b32.xlu1 %v339_v7, %s914_s12  ;;  %s518_s12 = scalar_lea.hbm %s1154_s5, %s641_s9 }
  0xce   : > { %382 = vrot.lane.b32.xlu0 %v340_v10, %s912_s10  ;;  %s522_s27 = sshll.u32 %s518_s12, 4  ;;  %s523_s27 = int_to_ptr.hbm [resolvable:$true] %s522_s27 }
  0xcf   : > { %s847_s28 = sshra.s32 %s523_s27, 4  ;;  %s848_s28 = int_to_ptr.hbm [resolvable:$true] %s847_s28 }
  0xd0   : > { %s849_s30 = scalar_lea.hbm %s848_s28, 16  ;;  %p854_p9 = scmp.lt.s32.totalorder %s848_s28, %s1154_s5 }
  0xd1   : > { %p850_p1 = scmp.ne.s32.totalorder %s848_s28, %s849_s30 }
  0xd3   : > { %p851_p4 = pnand %p850_p1, %p1017_p5 }
  0xd5   : > { %345 = vrot.lane.b32.xlu2 %v339_v7, %s915_s15  ;;  %360 = vrot.lane.b32.xlu1 %v340_v10, %s916_s16  ;;  %p852_p8 = pneg %p851_p4 }
  0xd6   : > { %358 = vrot.lane.b32.xlu0 %v339_v7, %s916_s16 }
  0xdd   : > { %441 = vperm.xlu1 %738, %v437_v44   ;;  %446 = vperm.xlu2 %739, %v438_v45  }
  0xde   : > { %347 = vrot.lane.b32.xlu0 %v340_v10, %s915_s15  ;;  %v354_v10 = vperm.slane %v1070_v20, 0  ;;  %s273_s15 = scalar_lea.vmem [#allocation8], %s621_s7  ;;  %s853_s7 = scalar_lea.hbm %s1154_s5, 32 }
  0xdf   : > { %s520_s16 = sshll.u32 %s273_s15, 4  ;;  %p855_p10 = scmp.lt.s32.totalorder %s853_s7, %s849_s30  ;;  %s521_s16 = int_to_ptr.vmem [resolvable:$true] %s520_s16 }
  0xe1   : > { %p856_p2 = por %p855_p10, %p854_p9 }
  0xe3   : > { %p857_p11 = pnand %p856_p2, %p852_p8 }
 0x10f   : > { %v403_v11 = vpop.permute.xlu2 %402 }
 0x117   : > { %v405_v16 = vpop.permute.xlu2 %404 }
 0x118   : > { %v407_v32 = vsel %vm406_vm5, %v403_v11, %v405_v16  ;;  %v408_v34 = vsel %vm406_vm5, %v405_v16, %v403_v11  ;;  %v355_v11 = vperm.slane %v1074_v23, 0 }
 0x119   : > { %v411_v38 = vmul.f32 %v409_v31, %v407_v32  ;;  %v412_v42 = vmul.f32 %v410_v33, %v408_v34 }
 0x11f   : > { %v381_v37 = vpop.permute.xlu2 %380 }
 0x127   : > { %v414_v12 = vpop.permute.xlu1 %413  ;;  %v372_v54 = vpop.permute.xlu2 %371 }
 0x128   : > { %v425_v14 = vpop.permute.xlu0 %424 }
 0x12f   : > { %v416_v19 = vpop.permute.xlu1 %415 }
 0x130   : > { %v427_v21 = vpop.permute.xlu0 %426  ;;  %v418_v24 = vsel %vm417_vm3, %v414_v12, %v416_v19  ;;  %v419_v28 = vsel %vm417_vm3, %v416_v19, %v414_v12  ;;  %v346_v12 = vpop.permute.xlu2 %345  ;;  %v436_v19 = vld [vmem:[%s1151_s2 + $0x8] sm:$0xff] }
 0x131   : > { %v429_v25 = vsel %vm428_vm4, %v425_v14, %v427_v21  ;;  %v430_v26 = vsel %vm428_vm4, %v427_v21, %v425_v14  ;;  %v422_v35 = vmul.f32 %v420_v22, %v418_v24  ;;  %v423_v36 = vmul.f32 %v421_v27, %v419_v28 }
 0x132   : > { %v433_v29 = vmul.f32 %v741_v17, %v429_v25  ;;  %v434_v30 = vmul.f32 %v742_v18, %v430_v26 }
 0x134   : > { %463 = vmatpush.msrb.mxu0 %v433_v29  ;;  %642 = vmatpush.msra.mxu2 %v433_v29 }
 0x135   : > { %486 = vmatpush.msrb.mxu1 %v434_v30  ;;  %651 = vmatpush.msra.mxu3 %v434_v30 }
 0x136   : > { %464 = vmatpush.msrb.mxu0 %v422_v35  ;;  %643 = vmatpush.msra.mxu2 %v422_v35 }
 0x137   : > { %487 = vmatpush.msrb.mxu1 %v423_v36  ;;  %652 = vmatpush.msra.mxu3 %v423_v36  ;;  %v394_v41 = vpop.permute.xlu1 %393 }
 0x138   : > { %465 = vmatpush.msrb.mxu0 %v411_v38  ;;  %644 = vmatpush.msra.mxu2 %v411_v38  ;;  %v392_v43 = vpop.permute.xlu0 %391  ;;  %v447_v23 = vpop.permute.xlu2 %446 }
 0x139   : > { %488 = vmatpush.msrb.mxu1 %v412_v42  ;;  %653 = vmatpush.msra.mxu3 %v412_v42  ;;  %v396_v46 = vsel %vm395_vm6, %v392_v43, %v394_v41  ;;  %v397_v47 = vsel %vm395_vm6, %v394_v41, %v392_v43 }
 0x13a   : > { %v400_v48 = vmul.f32 %v398_v39, %v396_v46  ;;  %v401_v49 = vmul.f32 %v399_v40, %v397_v47 }
 0x13c   : > { %466 = vmatpush.msrb.mxu0 %v400_v48  ;;  %645 = vmatpush.msra.mxu2 %v400_v48 }
 0x13d   : > { %489 = vmatpush.msrb.mxu1 %v401_v49  ;;  %654 = vmatpush.msra.mxu3 %v401_v49 }
 0x13e   : > { %629 = vmatpush.msk.msrb.mxu0 %vm338_vm2, %v1058_v6  ;;  %646 = vmatpush.msk.msra.mxu2 %vm338_vm2, %v1058_v6 }
 0x13f   : > { %632 = vmatpush.msk.msrb.mxu1 %vm338_vm2, %v1062_v9  ;;  %655 = vmatpush.msk.msra.mxu3 %vm338_vm2, %v1062_v9  ;;  %v370_v53 = vpop.permute.xlu1 %369 }
 0x140   : > { %v383_v55 = vpop.permute.xlu0 %382  ;;  %v375_v57 = vsel %vm373_vm7, %v372_v54, %v370_v53  ;;  %v374_v61 = vsel %vm373_vm7, %v370_v53, %v372_v54 }
 0x141   : > { %v385_v58 = vsel %vm384_vm8, %v381_v37, %v383_v55  ;;  %v386_v59 = vsel %vm384_vm8, %v383_v55, %v381_v37  ;;  %v378_v0 = vmul.f32 %v376_v56, %v375_v57  ;;  %v379_v1 = vmul.f32 %v377_v60, %v374_v61 }
 0x142   : > { %v389_v62 = vmul.f32 %v387_v51, %v386_v59  ;;  %v390_v63 = vmul.f32 %v388_v52, %v385_v58 }
 0x144   : > { %468 = vmatpush.msrb.mxu0 %v389_v62  ;;  %647 = vmatpush.msra.mxu2 %v389_v62 }
 0x145   : > { %491 = vmatpush.msrb.mxu1 %v390_v63  ;;  %656 = vmatpush.msra.mxu3 %v390_v63 }
 0x146   : > { %469 = vmatpush.msrb.mxu0 %v378_v0  ;;  %648 = vmatpush.msra.mxu2 %v378_v0 }
 0x147   : > { %492 = vmatpush.msrb.mxu1 %v379_v1  ;;  %657 = vmatpush.msra.mxu3 %v379_v1  ;;  %v361_v4 = vpop.permute.xlu1 %360 }
 0x148   : > { %v359_v5 = vpop.permute.xlu0 %358 }
 0x149   : > { %v363_v6 = vsel %vm362_vm9, %v359_v5, %v361_v4  ;;  %v364_v7 = vsel %vm362_vm9, %v361_v4, %v359_v5 }
 0x14a   : > { %v367_v8 = vmul.f32 %v365_v2, %v364_v7  ;;  %v368_v9 = vmul.f32 %v366_v3, %v363_v6 }
 0x14c   : > { %470 = vmatpush.msrb.mxu0 %v367_v8  ;;  %649 = vmatpush.msra.mxu2 %v367_v8 }
 0x14d   : > { %493 = vmatpush.msrb.mxu1 %v368_v9  ;;  %658 = vmatpush.msra.mxu3 %v368_v9 }
 0x14f   : > { %v442_v20 = vpop.permute.xlu1 %441 }
 0x150   : > { %v348_v13 = vpop.permute.xlu0 %347 }
 0x151   : > { %v352_v14 = vsel %vm351_vm10, %v346_v12, %v348_v13  ;;  %v353_v16 = vsel %vm351_vm10, %v348_v13, %v346_v12 }
 0x152   : > { %v356_v17 = vmul.f32 %v354_v10, %v353_v16  ;;  %v357_v18 = vmul.f32 %v355_v11, %v352_v14 }
 0x154   : > { %471 = vmatpush.msrb.mxu0 %v356_v17  ;;  %650 = vmatpush.msra.mxu2 %v356_v17 }
 0x155   : > { %494 = vmatpush.msrb.mxu1 %v357_v18  ;;  %659 = vmatpush.msra.mxu3 %v357_v18 }
 0x156   : > { %631 = vmatmul.msk.f32.vlgmr.msra.gmra.mxu2 %vm449_vm11, %v436_v19  ;;  %634 = vmatmul.msk.f32.vlgmr.msra.gmra.mxu3 %vm449_vm11, %v436_v19 }
 0x157   : > { %630 = vmatmul.msk.f32.vlgmr.msrb.gmra.mxu0 %vm449_vm11, %v435_v15  ;;  %633 = vmatmul.msk.f32.vlgmr.msrb.gmra.mxu1 %vm449_vm11, %v435_v15 }
 0x1d4   : > { %v473_v21 = vpop.f32.mrf.mxu0  ;;  %v496_v22 = vpop.f32.mrf.mxu1 }
 0x1d5   : > { %v474_v24 = vadd.f32 %v473_v21, %v442_v20  ;;  %v497_v25 = vadd.f32 %v496_v22, %v442_v20 }
 0x1d9   : > { %v476_v26 = vpop.f32.mrf.mxu2  ;;  %v499_v27 = vpop.f32.mrf.mxu3 }
 0x1da   : > { %v477_v28 = vadd.f32 %v476_v26, %v447_v23  ;;  %v500_v29 = vadd.f32 %v499_v27, %v447_v23 }
 0x1dc   : > { %v502_v30 = vmax.f32 %v474_v24, %v477_v28  ;;  %v503_v31 = vmax.f32 %v497_v25, %v500_v29 }
 0x1de   : > { %504 = vst [vmem:[%s273_s15] sm:$0xff] %v502_v30 }
 0x1df   : > { %505 = vst [vmem:[%s273_s15 + $0x8] sm:$0xff] %v503_v31 }
 0x1e0   : > { %860 = shalt.err (!%p857_p11)
}
 0x1e1   : > { %670 = dma.vmem_to_hbm [thread:$0]  (%p1017_p5), %s521_s16, 256, %s523_s27, %s507_s22  }
 0x1e2 PF: > { %s534_s26 = sand.u32 1, %s891_s18   ;;  %p1160_p12 = scmp.ge.s32.totalorder %s903_s21, 2 }
 0x1e3   : > { %s535_s29 = scalar_lea.sflag [#allocation4], %s534_s26 }
 0x1e4   : > { %p684_p13 = pnand %p1160_p12, %p983_p6 }
 0x1e6   : > { %p685_p0 = pneg %p684_p13 }
 0x1e8   : > { %886 = dma.done.wait (%p685_p0), %s535_s29, 256  }
 0x1e9   : > { %888 = vsyncadd (%p685_p0), %s535_s29, 4294967040  ;;  %p19_p3 = scmp.ge.s32.totalorder %s1004_s14, 4   ;;  %s1161_s18 = smov %s895_s19 }
 0x1ea   : > { %s1162_s19 = smov %s899_s20  ;;  %s1163_s20 = smov %s1013_s17 }
 0x1eb   : > { %s1164_s21 = smov %s1004_s14  ;;  %21 = sbr.rel (!%p19_p3) target bundleno = 6 (0x6), region = 93 }
 0x1f0   :  { %541 = vsyncpa [#allocation3], 1 }
 0x1f1   :  { %543 = vsyncpa [#allocation3 + $0x1], 1 }
 0x1f2   :  { %544 = vsyncpa [#allocation6], 1 }
 0x1f3   :  { %545 = vsyncpa [#allocation4], 1 }
 0x1f4   :  { %547 = vsyncpa [#allocation4 + $0x1], 1 }

</bundles_post_ra>
